<compile_context>
chip_gen: v5e
topology: v5e:2x2
jax: 0.10.0
libtpu: 0.0.40
codegen_flags: <defaults>
</compile_context>

<pallas_src>
import jax
import jax.numpy as jnp
from jax.experimental import pallas as pl
from jax.experimental.pallas import tpu as pltpu


def _round_up(x, m):
    return (x + m - 1) // m * m


def dqn_kernel(x_ref, w1_ref, b1_ref, w2_ref, b2_ref,
               w3_ref, b3_ref, w4_ref, b4_ref, out_ref):
    # Hoist biases: read once, keep in f32 (outside any future inner loop).
    b1 = b1_ref[...]
    b2 = b2_ref[...]
    b3 = b3_ref[...]
    b4 = b4_ref[...]

    x = x_ref[...]                                     # (TB, D_in) bf16

    # fc1 + ReLU  (bf16 MXU matmul, f32 accumulate / bias / ReLU)
    h = jnp.dot(x, w1_ref[...], preferred_element_type=jnp.float32) + b1
    h = jnp.maximum(h, 0.0).astype(jnp.bfloat16)

    # fc2 + ReLU
    h = jnp.dot(h, w2_ref[...], preferred_element_type=jnp.float32) + b2
    h = jnp.maximum(h, 0.0).astype(jnp.bfloat16)

    # fc3 + ReLU
    h = jnp.dot(h, w3_ref[...], preferred_element_type=jnp.float32) + b3
    h = jnp.maximum(h, 0.0).astype(jnp.bfloat16)

    # Output layer (no activation). Unpadded (TB, d_out) f32 store: the block
    # spans the full array width so the HBM writeback is one contiguous DMA.
    y = jnp.dot(h, w4_ref[...], preferred_element_type=jnp.float32) + b4
    out_ref[...] = y.astype(out_ref.dtype)


def _choose_batch_tile(b, block_b, min_steps=2):
    """Pick (tb, b_pad):
       * tb is a multiple of 16 (bf16 minimum sublane tile),
       * batch padding is minimized (never a near-full extra tile),
       * the grid has >= min_steps steps when b is large enough, so v7x's two
         TensorCores both get work (harmless on single-TC v5e/v6e).
    """
    n_tiles = max(pl.cdiv(b, block_b), 1)
    if b >= min_steps * 16:
        n_tiles = max(n_tiles, min_steps)
    tb = _round_up(pl.cdiv(b, n_tiles), 16)
    b_pad = _round_up(b, tb)
    return tb, b_pad


def dqn_forward(x, params, *, block_b=2048, min_steps=2):
    """x: any shape (B, ...); flattened to (B, D_in) like nn.Flatten()."""
    b = x.shape[0]
    x2d = x.reshape(b, -1)
    d_in = x2d.shape[1]

    (w1, b1), (w2, b2), (w3, b3), (w4, b4) = params
    d_out = w4.shape[1]

    tb, b_pad = _choose_batch_tile(b, block_b, min_steps)

    # bf16 streamed input (zero-pad extra batch rows; padded rows compute
    # relu(bias) garbage but are sliced off below).
    x_bf = x2d.astype(jnp.bfloat16)
    if b_pad != b:
        x_bf = jnp.pad(x_bf, ((0, b_pad - b), (0, 0)))

    # bf16 weights (halve DMA bytes, native MXU path); biases stay f32.
    w1b = w1.astype(jnp.bfloat16)
    w2b = w2.astype(jnp.bfloat16)
    w3b = w3.astype(jnp.bfloat16)
    w4b = w4.astype(jnp.bfloat16)

    # Weights/biases: constant block index -> pinned in VMEM across grid steps.
    pinned = lambda a: pl.BlockSpec(a.shape, lambda i: (0,) * a.ndim)

    out = pl.pallas_call(
        dqn_kernel,
        out_shape=jax.ShapeDtypeStruct((b_pad, d_out), jnp.float32),
        grid_spec=pltpu.PrefetchScalarGridSpec(
            num_scalar_prefetch=0,
            grid=(b_pad // tb,),
            in_specs=[
                pl.BlockSpec((tb, d_in), lambda i: (i, 0)),   # streamed x tile
                pinned(w1b), pinned(b1),
                pinned(w2b), pinned(b2),
                pinned(w3b), pinned(b3),
                pinned(w4b), pinned(b4),
            ],
            out_specs=pl.BlockSpec((tb, d_out), lambda i: (i, 0)),
        ),
        compiler_params=pltpu.CompilerParams(
            dimension_semantics=("parallel",),   # megacore sharding on v7x
        ),
    )(x_bf, w1b, b1, w2b, b2, w3b, b3, w4b, b4)

    return out[:b, :]


def init_params(key, input_shape, output_shape):
    """Deterministic init mirroring the nn.Linear shapes of DQN.__init__."""
    dims = [(input_shape, 64), (64, 64), (64, 32), (32, output_shape)]
    params = []
    for d_in, d_out in dims:
        kw, kb, key = jax.random.split(key, 3)
        bound = 1.0 / jnp.sqrt(d_in)  # PyTorch Linear default init range
        w = jax.random.uniform(kw, (d_in, d_out), jnp.float32, -bound, bound)
        bias = jax.random.uniform(kb, (1, d_out), jnp.float32, -bound, bound)
        params.append((w, bias))
    return params


def dqn_reference(x, params):
    """Pure-JAX reference with the same bf16-matmul / f32-accumulate recipe."""
    h = x.reshape(x.shape[0], -1).astype(jnp.bfloat16)
    (w1, b1), (w2, b2), (w3, b3), (w4, b4) = params

    def layer(h, w, bb, act):
        y = jnp.dot(h, w.astype(jnp.bfloat16),
                    preferred_element_type=jnp.float32) + bb
        return jnp.maximum(y, 0.0).astype(jnp.bfloat16) if act else y

    h = layer(h, w1, b1, True)
    h = layer(h, w2, b2, True)
    h = layer(h, w3, b3, True)
    return layer(h, w4, b4, False)


# TODO(synk): when this forward feeds a DQN training step (online + target net
# on the same states), concatenate the two nets' weights along N inside this
# same kernel ([w_online | w_target] -> 128-wide layers) and fuse the TD loss:
# one set of LHS MXU pushes then serves both networks, roughly halving MXU
# time and doubling arithmetic per streamed HBM byte.  If that fusion adds an
# in-kernel reduction, the zero-padded batch rows must be masked first.


if __name__ == "__main__":
    key = jax.random.PRNGKey(0)

    input_shape = 32       # flattened feature count fed to fc1
    output_shape = 4       # number of actions

    kx, kx2, kp = jax.random.split(key, 3)
    params = init_params(kp, input_shape, output_shape)

    # Small shape with non-trivial trailing structure so nn.Flatten matters:
    # 4 * 8 == 32 features.
    batch = 2
    x = jax.random.normal(kx, (batch, 4, 8), dtype=jnp.float32)
    out = dqn_forward(x, params)
    out = jax.block_until_ready(out)
    ref = dqn_reference(x, params)
    assert out.shape == (batch, output_shape), out.shape
    assert jnp.allclose(out, ref, atol=1e-3, rtol=1e-3), "mismatch vs reference"

    # Awkward multi-tile batch: exercises minimal-padding tile choice and the
    # >= 2-step parallel grid (v7x TensorCore sharding path).
    batch2 = 520
    x2 = jax.random.normal(kx2, (batch2, input_shape), dtype=jnp.float32)
    out2 = jax.block_until_ready(dqn_forward(x2, params))
    ref2 = dqn_reference(x2, params)
    assert out2.shape == (batch2, output_shape), out2.shape
    assert jnp.allclose(out2, ref2, atol=1e-3, rtol=1e-3), "mismatch (multi-tile)"

    print("KERNEL_OK")
</pallas_src>

<mosaic_0001>
module attributes {stable_mosaic.version = 11 : i64} {
  func.func @dqn_kernel(%arg0: i32, %arg1: memref<16x32xbf16, #tpu.memory_space<vmem>>, %arg2: memref<32x64xbf16, #tpu.memory_space<vmem>>, %arg3: memref<1x64xf32, #tpu.memory_space<vmem>>, %arg4: memref<64x64xbf16, #tpu.memory_space<vmem>>, %arg5: memref<1x64xf32, #tpu.memory_space<vmem>>, %arg6: memref<64x32xbf16, #tpu.memory_space<vmem>>, %arg7: memref<1x32xf32, #tpu.memory_space<vmem>>, %arg8: memref<32x4xbf16, #tpu.memory_space<vmem>>, %arg9: memref<1x4xf32, #tpu.memory_space<vmem>>, %arg10: memref<16x4xf32, #tpu.memory_space<vmem>>) attributes {dimension_semantics = [#tpu.dimension_semantics<parallel>], iteration_bounds = array<i64: 1>, scalar_prefetch = 0 : i64, scratch_operands = 0 : i64, tpu.core_type = #tpu.core_type<tc>, window_params = [{transform_indices = @transform_0, window_bounds = array<i64: 16, 32>}, {pipeline_mode = #tpu.pipeline_mode<synchronous>, transform_indices = @transform_1, window_bounds = array<i64: 32, 64>}, {pipeline_mode = #tpu.pipeline_mode<synchronous>, transform_indices = @transform_2, window_bounds = array<i64: 1, 64>}, {pipeline_mode = #tpu.pipeline_mode<synchronous>, transform_indices = @transform_3, window_bounds = array<i64: 64, 64>}, {pipeline_mode = #tpu.pipeline_mode<synchronous>, transform_indices = @transform_4, window_bounds = array<i64: 1, 64>}, {pipeline_mode = #tpu.pipeline_mode<synchronous>, transform_indices = @transform_5, window_bounds = array<i64: 64, 32>}, {pipeline_mode = #tpu.pipeline_mode<synchronous>, transform_indices = @transform_6, window_bounds = array<i64: 1, 32>}, {pipeline_mode = #tpu.pipeline_mode<synchronous>, transform_indices = @transform_7, window_bounds = array<i64: 32, 4>}, {pipeline_mode = #tpu.pipeline_mode<synchronous>, transform_indices = @transform_8, window_bounds = array<i64: 1, 4>}, {transform_indices = @transform_9, window_bounds = array<i64: 16, 4>}]} {
    %c0 = arith.constant 0 : index
    %c0_0 = arith.constant 0 : index
    %0 = vector.load %arg3[%c0, %c0_0] : memref<1x64xf32, #tpu.memory_space<vmem>>, vector<1x64xf32>
    %c0_1 = arith.constant 0 : index
    %c0_2 = arith.constant 0 : index
    %1 = vector.load %arg5[%c0_1, %c0_2] : memref<1x64xf32, #tpu.memory_space<vmem>>, vector<1x64xf32>
    %c0_3 = arith.constant 0 : index
    %c0_4 = arith.constant 0 : index
    %2 = vector.load %arg7[%c0_3, %c0_4] : memref<1x32xf32, #tpu.memory_space<vmem>>, vector<1x32xf32>
    %c0_5 = arith.constant 0 : index
    %c0_6 = arith.constant 0 : index
    %3 = vector.load %arg9[%c0_5, %c0_6] : memref<1x4xf32, #tpu.memory_space<vmem>>, vector<1x4xf32>
    %c0_7 = arith.constant 0 : index
    %c0_8 = arith.constant 0 : index
    %4 = vector.load %arg1[%c0_7, %c0_8] : memref<16x32xbf16, #tpu.memory_space<vmem>>, vector<16x32xbf16>
    %c0_9 = arith.constant 0 : index
    %c0_10 = arith.constant 0 : index
    %5 = vector.load %arg2[%c0_9, %c0_10] : memref<32x64xbf16, #tpu.memory_space<vmem>>, vector<32x64xbf16>
    %cst = arith.constant dense<0.000000e+00> : vector<16x64xf32>
    %6 = tpu.matmul %4, %5, %cst {dimension_numbers = #tpu.dot_dimension_numbers<[1], [0], [0], [1], [0, 0, 1, 1], [], []>} : vector<16x32xbf16>, vector<32x64xbf16>, vector<16x64xf32> -> vector<16x64xf32>
    %7 = vector.broadcast %0 : vector<1x64xf32> to vector<16x64xf32>
    %8 = arith.addf %6, %7 : vector<16x64xf32>
    %cst_11 = arith.constant 0.000000e+00 : f32
    %9 = vector.broadcast %cst_11 : f32 to vector<16x64xf32>
    %10 = arith.maximumf %8, %9 : vector<16x64xf32>
    %11 = arith.truncf %10 : vector<16x64xf32> to vector<16x64xbf16>
    %c0_12 = arith.constant 0 : index
    %c0_13 = arith.constant 0 : index
    %12 = vector.load %arg4[%c0_12, %c0_13] : memref<64x64xbf16, #tpu.memory_space<vmem>>, vector<64x64xbf16>
    %cst_14 = arith.constant dense<0.000000e+00> : vector<16x64xf32>
    %13 = tpu.matmul %11, %12, %cst_14 {dimension_numbers = #tpu.dot_dimension_numbers<[1], [0], [0], [1], [0, 0, 1, 1], [], []>} : vector<16x64xbf16>, vector<64x64xbf16>, vector<16x64xf32> -> vector<16x64xf32>
    %14 = vector.broadcast %1 : vector<1x64xf32> to vector<16x64xf32>
    %15 = arith.addf %13, %14 : vector<16x64xf32>
    %cst_15 = arith.constant 0.000000e+00 : f32
    %16 = vector.broadcast %cst_15 : f32 to vector<16x64xf32>
    %17 = arith.maximumf %15, %16 : vector<16x64xf32>
    %18 = arith.truncf %17 : vector<16x64xf32> to vector<16x64xbf16>
    %c0_16 = arith.constant 0 : index
    %c0_17 = arith.constant 0 : index
    %19 = vector.load %arg6[%c0_16, %c0_17] : memref<64x32xbf16, #tpu.memory_space<vmem>>, vector<64x32xbf16>
    %cst_18 = arith.constant dense<0.000000e+00> : vector<16x32xf32>
    %20 = tpu.matmul %18, %19, %cst_18 {dimension_numbers = #tpu.dot_dimension_numbers<[1], [0], [0], [1], [0, 0, 1, 1], [], []>} : vector<16x64xbf16>, vector<64x32xbf16>, vector<16x32xf32> -> vector<16x32xf32>
    %21 = vector.broadcast %2 : vector<1x32xf32> to vector<16x32xf32>
    %22 = arith.addf %20, %21 : vector<16x32xf32>
    %cst_19 = arith.constant 0.000000e+00 : f32
    %23 = vector.broadcast %cst_19 : f32 to vector<16x32xf32>
    %24 = arith.maximumf %22, %23 : vector<16x32xf32>
    %25 = arith.truncf %24 : vector<16x32xf32> to vector<16x32xbf16>
    %c0_20 = arith.constant 0 : index
    %c0_21 = arith.constant 0 : index
    %26 = vector.load %arg8[%c0_20, %c0_21] : memref<32x4xbf16, #tpu.memory_space<vmem>>, vector<32x4xbf16>
    %cst_22 = arith.constant dense<0.000000e+00> : vector<16x4xf32>
    %27 = tpu.matmul %25, %26, %cst_22 {dimension_numbers = #tpu.dot_dimension_numbers<[1], [0], [0], [1], [0, 0, 1, 1], [], []>} : vector<16x32xbf16>, vector<32x4xbf16>, vector<16x4xf32> -> vector<16x4xf32>
    %28 = vector.broadcast %3 : vector<1x4xf32> to vector<16x4xf32>
    %29 = arith.addf %27, %28 : vector<16x4xf32>
    %c0_23 = arith.constant 0 : index
    %c0_24 = arith.constant 0 : index
    %30 = vector.load %arg10[%c0_23, %c0_24] : memref<16x4xf32, #tpu.memory_space<vmem>>, vector<16x4xf32>
    tpu.vector_store %arg10[%c0_23, %c0_24], %29 {strides = array<i32>} : memref<16x4xf32, #tpu.memory_space<vmem>>, vector<16x4xf32>,
    return
  }
  func.func @transform_0(%arg0: i32) -> (i32, i32) {
    %c0_i32 = arith.constant 0 : i32
    %c0_i32_0 = arith.constant 0 : i32
    return %arg0, %c0_i32 : i32, i32
  }
  func.func @transform_1(%arg0: i32) -> (i32, i32) {
    %c0_i32 = arith.constant 0 : i32
    %c0_i32_0 = arith.constant 0 : i32
    %c0_i32_1 = arith.constant 0 : i32
    return %c0_i32, %c0_i32_0 : i32, i32
  }
  func.func @transform_2(%arg0: i32) -> (i32, i32) {
    %c0_i32 = arith.constant 0 : i32
    %c0_i32_0 = arith.constant 0 : i32
    %c0_i32_1 = arith.constant 0 : i32
    return %c0_i32, %c0_i32_0 : i32, i32
  }
  func.func @transform_3(%arg0: i32) -> (i32, i32) {
    %c0_i32 = arith.constant 0 : i32
    %c0_i32_0 = arith.constant 0 : i32
    %c0_i32_1 = arith.constant 0 : i32
    return %c0_i32, %c0_i32_0 : i32, i32
  }
  func.func @transform_4(%arg0: i32) -> (i32, i32) {
    %c0_i32 = arith.constant 0 : i32
    %c0_i32_0 = arith.constant 0 : i32
    %c0_i32_1 = arith.constant 0 : i32
    return %c0_i32, %c0_i32_0 : i32, i32
  }
  func.func @transform_5(%arg0: i32) -> (i32, i32) {
    %c0_i32 = arith.constant 0 : i32
    %c0_i32_0 = arith.constant 0 : i32
    %c0_i32_1 = arith.constant 0 : i32
    return %c0_i32, %c0_i32_0 : i32, i32
  }
  func.func @transform_6(%arg0: i32) -> (i32, i32) {
    %c0_i32 = arith.constant 0 : i32
    %c0_i32_0 = arith.constant 0 : i32
    %c0_i32_1 = arith.constant 0 : i32
    return %c0_i32, %c0_i32_0 : i32, i32
  }
  func.func @transform_7(%arg0: i32) -> (i32, i32) {
    %c0_i32 = arith.constant 0 : i32
    %c0_i32_0 = arith.constant 0 : i32
    %c0_i32_1 = arith.constant 0 : i32
    return %c0_i32, %c0_i32_0 : i32, i32
  }
  func.func @transform_8(%arg0: i32) -> (i32, i32) {
    %c0_i32 = arith.constant 0 : i32
    %c0_i32_0 = arith.constant 0 : i32
    %c0_i32_1 = arith.constant 0 : i32
    return %c0_i32, %c0_i32_0 : i32, i32
  }
  func.func @transform_9(%arg0: i32) -> (i32, i32) {
    %c0_i32 = arith.constant 0 : i32
    %c0_i32_0 = arith.constant 0 : i32
    return %arg0, %c0_i32 : i32, i32
  }
}

</mosaic_0001>

<bundles_post_ra>
// kernel: tpu_custom_call.1
= control target key start
LH: loop header
LB: loop body
LE: loop exit
PB: predicated region body
PF: predicated region fallthrough
CT: control target
= control target key end

     0   :  { %14 = vsyncpa [#allocation3], 0  ;;  %s357_s12 = smov [#allocation2]   ;;  %s358_s14 = smov 64   ;;  %s471_s0 = inlined_call_operand.hbm [shape: bf16[16,32], index: 0, kind: input, shape index: {}]   ;;  %s472_s1 = inlined_call_operand.vmem [shape: bf16[32,64], index: 1, kind: input, shape index: {}]   ;;  %s473_s2 = inlined_call_operand.vmem [shape: f32[1,64], index: 2, kind: input, shape index: {}]   ;;  %s474_s3 = inlined_call_operand.vmem [shape: bf16[64,64], index: 3, kind: input, shape index: {}]   ;;  %s475_s4 = inlined_call_operand.vmem [shape: f32[1,64], index: 4, kind: input, shape index: {}]   ;;  %s476_s5 = inlined_call_operand.vmem [shape: bf16[64,32], index: 5, kind: input, shape index: {}]   ;;  %s477_s6 = inlined_call_operand.vmem [shape: f32[1,32], index: 6, kind: input, shape index: {}]   ;;  %s478_s7 = inlined_call_operand.vmem [shape: bf16[32,4], index: 7, kind: input, shape index: {}]   ;;  %s479_s8 = inlined_call_operand.vmem [shape: f32[1,4], index: 8, kind: input, shape index: {}]   ;;  %s480_s9 = inlined_call_operand.vmem [shape: f32[16,4], index: 9, kind: output, shape index: {}]  }
   0x1   :  { %s19_s11 = sshll.u32 %s471_s0, 4  ;;  %s21_s13 = sshll.u32 %s357_s12, 4  ;;  %s20_s11 = int_to_ptr.hbm [resolvable:$true] %s19_s11  ;;  %s22_s13 = int_to_ptr.vmem [resolvable:$true] %s21_s13 }
   0x2   :  { %s359_s15 = smov 4  }
   0x3   :  { %27 = dma.hbm_to_vmem [thread:$0]  %s20_s11, 128, %s22_s13, [#allocation3], %s358_s14, %s358_s14, %s359_s15  }
   0x4   :  { %355 = dma.done.wait [#allocation3], 128  }
   0x5   :  { %356 = vsyncadd [#allocation3], 4294967168  ;;  %v313_v0 = vld [vmem:[%s472_s1 + $0x8] sm:$0xff]  ;;  %v312_v1 = vld [vmem:[%s472_s1] sm:$0xff]  ;;  %vm79_vm0 = vcmask 261120   ;;  %vm135_vm1 = vcmask 523264  }
   0x6   :  { %89 = vmatpush.bf16.msra.mxu0 %v313_v0  ;;  %v311_v2 = vld [vmem:[#allocation2] sm:$0xff]  ;;  %v317_v3 = vld [vmem:[%s474_s3 + $0x18] sm:$0xff]  ;;  %v316_v4 = vld [vmem:[%s474_s3 + $0x10] sm:$0xff]  ;;  %vm247_vm2 = vcmask 31744  }
   0x7   :  { %143 = vmatpush.bf16.msra.mxu1 %v317_v3  ;;  %v315_v5 = vld [vmem:[%s474_s3 + $0x8] sm:$0xff]  ;;  %v314_v6 = vld [vmem:[%s474_s3] sm:$0xff]  ;;  %v321_v15 = vld [vmem:[%s476_s5 + $0x18] sm:$0xff] }
   0x8   :  { %v327_v8 = vld [vmem:[%s473_s2] ss:$0 sm:$0xff]  ;;  %198 = vmatpush.bf16.msra.mxu2 %v321_v15  ;;  %v320_v16 = vld [vmem:[%s476_s5 + $0x10] sm:$0xff]  ;;  %v319_v17 = vld [vmem:[%s476_s5 + $0x8] sm:$0xff] }
   0x9   :  { %v318_v18 = vld [vmem:[%s476_s5] sm:$0xff]  ;;  %v323_v27 = vld [vmem:[%s478_s7 + $0x8] sm:$0xff] }
   0xa   :  { %90 = vmatpush.bf16.msra.mxu0 %v312_v1  ;;  %v328_v20 = vld [vmem:[%s475_s4] ss:$0 sm:$0xff]  ;;  %239 = vmatpush.bf16.msra.mxu3 %v323_v27 }
   0xb   :  { %144 = vmatpush.bf16.msra.mxu1 %v316_v4  ;;  %v322_v28 = vld [vmem:[%s478_s7] sm:$0xff] }
   0xc   :  { %199 = vmatpush.bf16.msra.mxu2 %v320_v16  ;;  %v329_v30 = vld [vmem:[%s477_s6] ss:$0 sm:$0xff] }
   0xd   :  { %267 = vmatmul.msk.bf16.vlgmr.msra.gmra.mxu0 %vm79_vm0, %v311_v2  ;;  %v330_v37 = vld [vmem:[%s479_s8] ss:$0 sm:$0xff] }
   0xe   :  { %240 = vmatpush.bf16.msra.mxu3 %v322_v28 }
   0xf   :  { %145 = vmatpush.bf16.msra.mxu1 %v315_v5 }
  0x10   :  { %200 = vmatpush.bf16.msra.mxu2 %v319_v17 }
  0x13   :  { %146 = vmatpush.bf16.msra.mxu1 %v314_v6 }
  0x14   :  { %201 = vmatpush.bf16.msra.mxu2 %v318_v18 }
  0x8a   :  { %v92_v7 = vpop.f32.mrf.mxu0 }
  0x8b   :  { %v93_v9 = vadd.f32 %v327_v8, %v92_v7 }
  0x8d   :  { %v97_v12 = vmax.f32 %v93_v9, 0.0 }
  0x92   :  { %v94_v10 = vpop.f32.mrf.mxu0 }
  0x93   :  { %v95_v11 = vadd.f32 %v327_v8, %v94_v10 }
  0x95   :  { %v98_v13 = vmax.f32 %v95_v11, 0.0 }
  0x97   :  { %v99_v14 = vpack.c.bf16 %v98_v13, %v97_v12 }
  0x99   :  { %284 = vmatmul.msk.bf16.vlgmr.msra.gmra.mxu1 %vm135_vm1, %v99_v14 }
 0x116   :  { %v148_v19 = vpop.f32.mrf.mxu1 }
 0x117   :  { %v149_v21 = vadd.f32 %v328_v20, %v148_v19 }
 0x119   :  { %v153_v24 = vmax.f32 %v149_v21, 0.0 }
 0x11e   :  { %v150_v22 = vpop.f32.mrf.mxu1 }
 0x11f   :  { %v151_v23 = vadd.f32 %v328_v20, %v150_v22 }
 0x121   :  { %v154_v25 = vmax.f32 %v151_v23, 0.0 }
 0x123   :  { %v155_v26 = vpack.c.bf16 %v154_v25, %v153_v24 }
 0x125   :  { %301 = vmatmul.msk.bf16.vlgmr.msra.gmra.mxu2 %vm135_vm1, %v155_v26 }
 0x1a8   :  { %v203_v29 = vpop.f32.mrf.mxu2 }
 0x1a9   :  { %v204_v31 = vadd.f32 %v329_v30, %v203_v29 }
 0x1ab   :  { %v208_v34 = vmax.f32 %v204_v31, 0.0 }
 0x1b0   :  { %v205_v32 = vpop.f32.mrf.mxu2 }
 0x1b1   :  { %v206_v33 = vadd.f32 %v329_v30, %v205_v32 }
 0x1b3   :  { %v209_v35 = vmax.f32 %v206_v33, 0.0 }
 0x1b5   :  { %v210_v36 = vpack.c.bf16 %v209_v35, %v208_v34 }
 0x1b7   :  { %310 = vmatmul.msk.bf16.vlgmr.msra.gmra.mxu3 %vm79_vm0, %v210_v36 }
 0x23a   :  { %v242_v38 = vpop.f32.mrf.mxu3 }
 0x23b   :  { %v243_v39 = vadd.f32 %v330_v37, %v242_v38 }
 0x23d   :  { %248 = vst.msk [vmem:[%s480_s9] sm:$0xff] %vm247_vm2, %v243_v39 }
 0x242   :  { %v244_v40 = vpop.f32.mrf.mxu3 }
 0x243   :  { %v245_v41 = vadd.f32 %v330_v37, %v244_v40 }
 0x245   :  { %249 = vst.msk [vmem:[%s480_s9 + $0x8] sm:$0xff] %vm247_vm2, %v245_v41 }
 0x246   :  { %254 = vsyncpa [#allocation3], 1 }

</bundles_post_ra>
